<compile_context>
chip_gen: v7x
topology: tpu7x:2x2x1
jax: 0.10.0
libtpu: 0.0.40
codegen_flags: <defaults>
</compile_context>

<pallas_src>
import functools

import jax
import jax.numpy as jnp
from jax.experimental import pallas as pl
from jax.experimental.pallas import tpu as pltpu

IN_F, H1, H2, OUT_F = 4, 64, 32, 2
_LANE_ALIGN = 512          # batch padding / chunk granularity (multiple of 128 lanes)


def _round_up(n, m):
    return ((n + m - 1) // m) * m


def _cdiv(a, b):
    return -(-a // b)


def _mlp_kernel(x_ref, w1_ref, b1_ref, w2_ref, b2_ref, w3_ref, b3_ref, o_ref,
                *, chunk):
    # Feature-major ("batch on lanes") layout:
    #   x_ref [4, TILE_B], o_ref [2, TILE_B]; weights in PyTorch [out, in] layout,
    #   VMEM-resident via constant index_maps.  MXU inputs in bf16, f32 accum.
    w1 = w1_ref[...].astype(jnp.bfloat16)    # [64, 4]
    w2 = w2_ref[...].astype(jnp.bfloat16)    # [32, 64]
    w3 = w3_ref[...].astype(jnp.bfloat16)    # [2, 32]
    b1 = b1_ref[...]                         # [64, 1] f32
    b2 = b2_ref[...]                         # [32, 1] f32
    b3 = b3_ref[...]                         # [2, 1]  f32

    tile_b = x_ref.shape[-1]
    # Static (trace-time) chunk loop over 512-aligned lane sub-blocks: keeps the
    # [64, chunk] / [32, chunk] intermediates to a few MiB of VMEM regardless of
    # how large the DMA tile is, so TILE_B can be raised to amortize the
    # per-grid-step pipeline overhead without blowing VMEM.
    for lo in range(0, tile_b, chunk):
        cs = min(chunk, tile_b - lo)
        x = x_ref[:, lo:lo + cs].astype(jnp.bfloat16)               # [4,  cs]
        h1 = jnp.dot(w1, x, preferred_element_type=jnp.float32) + b1
        h1 = jnp.maximum(h1, 0.0).astype(jnp.bfloat16)              # [64, cs]
        h2 = jnp.dot(w2, h1, preferred_element_type=jnp.float32) + b2
        h2 = jnp.maximum(h2, 0.0).astype(jnp.bfloat16)              # [32, cs]
        y = jnp.dot(w3, h2, preferred_element_type=jnp.float32) + b3
        o_ref[:, lo:lo + cs] = y.astype(o_ref.dtype)                # [2, cs] lane-dense


def frame_predictor_forward_fm(x_fm, params, *, max_tile_b=65536, chunk_b=4096):
    """Feature-major fast path: x_fm [4, B] float32 -> [2, B] float32.

    Keeping activations feature-major end-to-end makes the kernel's HBM traffic
    the ideal ~24 B/sample (16 in + 8 out) with fully lane-dense loads/stores
    and no transposes.  For zero pad-copy overhead, feed B as a multiple of 512.
    """
    w1, b1, w2, b2, w3, b3 = params
    assert x_fm.ndim == 2 and x_fm.shape[0] == IN_F, x_fm.shape
    assert chunk_b % _LANE_ALIGN == 0
    B = x_fm.shape[1]

    # Tiling: pad B to a multiple of 512 (bounded waste), split into roughly
    # equal 512-aligned tiles of at most `max_tile_b` lanes, and keep the grid
    # >= 2 when possible so both of v7x's TensorCores get work.
    b_aligned = _round_up(max(B, 1), _LANE_ALIGN)
    num_tiles = _cdiv(b_aligned, max_tile_b)
    if num_tiles == 1 and b_aligned >= 2 * _LANE_ALIGN:
        num_tiles = 2
    tile_b = _round_up(_cdiv(b_aligned, num_tiles), _LANE_ALIGN)
    b_pad = tile_b * num_tiles
    chunk = min(chunk_b, tile_b)
    grid = (num_tiles,)

    x_p = x_fm.astype(jnp.float32)
    if b_pad != B:
        x_p = jnp.pad(x_p, ((0, 0), (0, b_pad - B)))

    b1c = b1.reshape(H1, 1).astype(jnp.float32)
    b2c = b2.reshape(H2, 1).astype(jnp.float32)
    b3c = b3.reshape(OUT_F, 1).astype(jnp.float32)

    const = lambda i: (0, 0)
    in_specs = [
        pl.BlockSpec((IN_F, tile_b), lambda i: (0, i)),   # x tile: batch on lanes
        pl.BlockSpec((H1, IN_F), const),                  # w1 (VMEM-resident)
        pl.BlockSpec((H1, 1), const),                     # b1
        pl.BlockSpec((H2, H1), const),                    # w2
        pl.BlockSpec((H2, 1), const),                     # b2
        pl.BlockSpec((OUT_F, H2), const),                 # w3
        pl.BlockSpec((OUT_F, 1), const),                  # b3
    ]
    out_spec = pl.BlockSpec((OUT_F, tile_b), lambda i: (0, i))

    flops = 2 * b_pad * (IN_F * H1 + H1 * H2 + H2 * OUT_F)
    bytes_accessed = 4 * (x_p.size + OUT_F * b_pad + w1.size + w2.size + w3.size
                          + b1.size + b2.size + b3.size)

    out_fm = pl.pallas_call(
        functools.partial(_mlp_kernel, chunk=chunk),
        out_shape=jax.ShapeDtypeStruct((OUT_F, b_pad), jnp.float32),
        grid=grid,
        in_specs=in_specs,
        out_specs=out_spec,
        compiler_params=pltpu.CompilerParams(
            # independent batch tiles -> shard the grid across v7x's 2 TCs
            dimension_semantics=("parallel",),
            # headroom for max_tile_b sweeps; still below v7x's 64 MiB physical VMEM
            vmem_limit_bytes=48 * 1024 * 1024,
        ),
        cost_estimate=pl.CostEstimate(
            flops=flops, transcendentals=0, bytes_accessed=bytes_accessed),
    )(x_p, w1.astype(jnp.float32), b1c, w2.astype(jnp.float32), b2c,
      w3.astype(jnp.float32), b3c)

    return out_fm[:, :B] if b_pad != B else out_fm


def frame_predictor_forward(x, params, **kwargs):
    """PyTorch-layout compatibility wrapper: x [B, 4] -> [B, 2].

    The x.T / .T here are exactly the extra HBM passes the feature-major API
    avoids; prefer `frame_predictor_forward_fm` when the producer/consumer can
    keep activations feature-major.
    """
    return frame_predictor_forward_fm(x.T, params, **kwargs).T


def init_params(key):
    # PyTorch nn.Linear layout: W [out_features, in_features], b [out_features].
    k1, k2, k3, k4, k5, k6 = jax.random.split(key, 6)
    w1 = jax.random.normal(k1, (H1, IN_F), jnp.float32) * 0.1
    b1 = jax.random.normal(k2, (H1,), jnp.float32) * 0.1
    w2 = jax.random.normal(k3, (H2, H1), jnp.float32) * 0.1
    b2 = jax.random.normal(k4, (H2,), jnp.float32) * 0.1
    w3 = jax.random.normal(k5, (OUT_F, H2), jnp.float32) * 0.1
    b3 = jax.random.normal(k6, (OUT_F,), jnp.float32) * 0.1
    return (w1, b1, w2, b2, w3, b3)


def reference_forward(x, params):
    # Mirrors PyTorch: relu(x @ W1.T + b1) -> relu(. @ W2.T + b2) -> . @ W3.T + b3
    w1, b1, w2, b2, w3, b3 = params
    h1 = jnp.maximum(x @ w1.T + b1, 0.0)
    h2 = jnp.maximum(h1 @ w2.T + b2, 0.0)
    return h2 @ w3.T + b3


if __name__ == "__main__":
    key = jax.random.PRNGKey(0)
    kx, kp = jax.random.split(key)
    params = init_params(kp)

    # 1) Small batch in the module's native [B, 4] layout (compat wrapper).
    x_small = jax.random.normal(kx, (8, IN_F), jnp.float32)
    out_small = jax.block_until_ready(frame_predictor_forward(x_small, params))
    ref_small = reference_forward(x_small, params)
    assert out_small.shape == (8, OUT_F), out_small.shape
    assert jnp.allclose(out_small, ref_small, atol=2e-2, rtol=2e-2), \
        "mismatch vs pure-JAX reference (small batch)"

    # 2) Feature-major fast path on a larger, non-512-multiple batch:
    #    exercises the multi-tile grid (>=2 tiles), the in-kernel chunk loop
    #    (4096 + 512 tail) and the bounded batch-tail padding.
    x_fm = jax.random.normal(kx, (IN_F, 9000), jnp.float32)
    out_fm = jax.block_until_ready(frame_predictor_forward_fm(x_fm, params))
    ref_fm = reference_forward(x_fm.T, params).T
    assert out_fm.shape == (OUT_F, 9000), out_fm.shape
    assert jnp.allclose(out_fm, ref_fm, atol=2e-2, rtol=2e-2), \
        "mismatch vs pure-JAX reference (feature-major batch)"

    print("KERNEL_OK")
</pallas_src>

<mosaic_0001>
module attributes {stable_mosaic.version = 11 : i64} {
  func.func @_mlp_kernel(%arg0: i32, %arg1: memref<4x512xf32, #tpu.memory_space<vmem>>, %arg2: memref<64x4xf32, #tpu.memory_space<vmem>>, %arg3: memref<64x1xf32, #tpu.memory_space<vmem>>, %arg4: memref<32x64xf32, #tpu.memory_space<vmem>>, %arg5: memref<32x1xf32, #tpu.memory_space<vmem>>, %arg6: memref<2x32xf32, #tpu.memory_space<vmem>>, %arg7: memref<2x1xf32, #tpu.memory_space<vmem>>, %arg8: memref<2x512xf32, #tpu.memory_space<vmem>>) attributes {dimension_semantics = [#tpu.dimension_semantics<parallel>], iteration_bounds = array<i64: 1>, scalar_prefetch = 0 : i64, scratch_operands = 0 : i64, tpu.core_type = #tpu.core_type<tc>, window_params = [{transform_indices = @transform_0, window_bounds = array<i64: 4, 512>}, {pipeline_mode = #tpu.pipeline_mode<synchronous>, transform_indices = @transform_1, window_bounds = array<i64: 64, 4>}, {pipeline_mode = #tpu.pipeline_mode<synchronous>, transform_indices = @transform_2, window_bounds = array<i64: 64, 1>}, {pipeline_mode = #tpu.pipeline_mode<synchronous>, transform_indices = @transform_3, window_bounds = array<i64: 32, 64>}, {pipeline_mode = #tpu.pipeline_mode<synchronous>, transform_indices = @transform_4, window_bounds = array<i64: 32, 1>}, {pipeline_mode = #tpu.pipeline_mode<synchronous>, transform_indices = @transform_5, window_bounds = array<i64: 2, 32>}, {pipeline_mode = #tpu.pipeline_mode<synchronous>, transform_indices = @transform_6, window_bounds = array<i64: 2, 1>}, {transform_indices = @transform_7, window_bounds = array<i64: 2, 512>}]} {
    %c0 = arith.constant 0 : index
    %c0_0 = arith.constant 0 : index
    %0 = vector.load %arg2[%c0, %c0_0] : memref<64x4xf32, #tpu.memory_space<vmem>>, vector<64x4xf32>
    %1 = arith.truncf %0 : vector<64x4xf32> to vector<64x4xbf16>
    %c0_1 = arith.constant 0 : index
    %c0_2 = arith.constant 0 : index
    %2 = vector.load %arg4[%c0_1, %c0_2] : memref<32x64xf32, #tpu.memory_space<vmem>>, vector<32x64xf32>
    %3 = arith.truncf %2 : vector<32x64xf32> to vector<32x64xbf16>
    %c0_3 = arith.constant 0 : index
    %c0_4 = arith.constant 0 : index
    %4 = vector.load %arg6[%c0_3, %c0_4] : memref<2x32xf32, #tpu.memory_space<vmem>>, vector<2x32xf32>
    %5 = arith.truncf %4 : vector<2x32xf32> to vector<2x32xbf16>
    %c0_5 = arith.constant 0 : index
    %c0_6 = arith.constant 0 : index
    %6 = vector.load %arg3[%c0_5, %c0_6] : memref<64x1xf32, #tpu.memory_space<vmem>>, vector<64x1xf32>
    %c0_7 = arith.constant 0 : index
    %c0_8 = arith.constant 0 : index
    %7 = vector.load %arg5[%c0_7, %c0_8] : memref<32x1xf32, #tpu.memory_space<vmem>>, vector<32x1xf32>
    %c0_9 = arith.constant 0 : index
    %c0_10 = arith.constant 0 : index
    %8 = vector.load %arg7[%c0_9, %c0_10] : memref<2x1xf32, #tpu.memory_space<vmem>>, vector<2x1xf32>
    %c0_11 = arith.constant 0 : index
    %c0_12 = arith.constant 0 : index
    %9 = vector.load %arg1[%c0_11, %c0_12] : memref<4x512xf32, #tpu.memory_space<vmem>>, vector<4x512xf32>
    %10 = arith.truncf %9 : vector<4x512xf32> to vector<4x512xbf16>
    %cst = arith.constant dense<0.000000e+00> : vector<64x512xf32>
    %11 = tpu.matmul %1, %10, %cst {dimension_numbers = #tpu.dot_dimension_numbers<[1], [0], [0], [1], [0, 0, 1, 1], [], []>} : vector<64x4xbf16>, vector<4x512xbf16>, vector<64x512xf32> -> vector<64x512xf32>
    %12 = vector.broadcast %6 : vector<64x1xf32> to vector<64x512xf32>
    %13 = arith.addf %11, %12 : vector<64x512xf32>
    %cst_13 = arith.constant 0.000000e+00 : f32
    %14 = vector.broadcast %cst_13 : f32 to vector<64x512xf32>
    %15 = arith.maximumf %13, %14 : vector<64x512xf32>
    %16 = arith.truncf %15 : vector<64x512xf32> to vector<64x512xbf16>
    %cst_14 = arith.constant dense<0.000000e+00> : vector<32x512xf32>
    %17 = tpu.matmul %3, %16, %cst_14 {dimension_numbers = #tpu.dot_dimension_numbers<[1], [0], [0], [1], [0, 0, 1, 1], [], []>} : vector<32x64xbf16>, vector<64x512xbf16>, vector<32x512xf32> -> vector<32x512xf32>
    %18 = vector.broadcast %7 : vector<32x1xf32> to vector<32x512xf32>
    %19 = arith.addf %17, %18 : vector<32x512xf32>
    %cst_15 = arith.constant 0.000000e+00 : f32
    %20 = vector.broadcast %cst_15 : f32 to vector<32x512xf32>
    %21 = arith.maximumf %19, %20 : vector<32x512xf32>
    %22 = arith.truncf %21 : vector<32x512xf32> to vector<32x512xbf16>
    %cst_16 = arith.constant dense<0.000000e+00> : vector<2x512xf32>
    %23 = tpu.matmul %5, %22, %cst_16 {dimension_numbers = #tpu.dot_dimension_numbers<[1], [0], [0], [1], [0, 0, 1, 1], [], []>} : vector<2x32xbf16>, vector<32x512xbf16>, vector<2x512xf32> -> vector<2x512xf32>
    %24 = vector.broadcast %8 : vector<2x1xf32> to vector<2x512xf32>
    %25 = arith.addf %23, %24 : vector<2x512xf32>
    %c0_17 = arith.constant 0 : index
    %c0_18 = arith.constant 0 : index
    %26 = vector.load %arg8[%c0_17, %c0_18] : memref<2x512xf32, #tpu.memory_space<vmem>>, vector<2x512xf32>
    tpu.vector_store %arg8[%c0_17, %c0_18], %25 {strides = array<i32>} : memref<2x512xf32, #tpu.memory_space<vmem>>, vector<2x512xf32>,
    return
  }
  func.func @transform_0(%arg0: i32) -> (i32, i32) {
    %c0_i32 = arith.constant 0 : i32
    %c0_i32_0 = arith.constant 0 : i32
    return %c0_i32, %arg0 : i32, i32
  }
  func.func @transform_1(%arg0: i32) -> (i32, i32) {
    %c0_i32 = arith.constant 0 : i32
    %c0_i32_0 = arith.constant 0 : i32
    %c0_i32_1 = arith.constant 0 : i32
    return %c0_i32, %c0_i32_0 : i32, i32
  }
  func.func @transform_2(%arg0: i32) -> (i32, i32) {
    %c0_i32 = arith.constant 0 : i32
    %c0_i32_0 = arith.constant 0 : i32
    %c0_i32_1 = arith.constant 0 : i32
    return %c0_i32, %c0_i32_0 : i32, i32
  }
  func.func @transform_3(%arg0: i32) -> (i32, i32) {
    %c0_i32 = arith.constant 0 : i32
    %c0_i32_0 = arith.constant 0 : i32
    %c0_i32_1 = arith.constant 0 : i32
    return %c0_i32, %c0_i32_0 : i32, i32
  }
  func.func @transform_4(%arg0: i32) -> (i32, i32) {
    %c0_i32 = arith.constant 0 : i32
    %c0_i32_0 = arith.constant 0 : i32
    %c0_i32_1 = arith.constant 0 : i32
    return %c0_i32, %c0_i32_0 : i32, i32
  }
  func.func @transform_5(%arg0: i32) -> (i32, i32) {
    %c0_i32 = arith.constant 0 : i32
    %c0_i32_0 = arith.constant 0 : i32
    %c0_i32_1 = arith.constant 0 : i32
    return %c0_i32, %c0_i32_0 : i32, i32
  }
  func.func @transform_6(%arg0: i32) -> (i32, i32) {
    %c0_i32 = arith.constant 0 : i32
    %c0_i32_0 = arith.constant 0 : i32
    %c0_i32_1 = arith.constant 0 : i32
    return %c0_i32, %c0_i32_0 : i32, i32
  }
  func.func @transform_7(%arg0: i32) -> (i32, i32) {
    %c0_i32 = arith.constant 0 : i32
    %c0_i32_0 = arith.constant 0 : i32
    return %c0_i32, %arg0 : i32, i32
  }
}

</mosaic_0001>

<bundles_post_ra>
// kernel: tpu_custom_call.1
= control target key start
LH: loop header
LB: loop body
LE: loop exit
PB: predicated region body
PF: predicated region fallthrough
CT: control target
= control target key end

     0   :  { %vm126_vm0 = vcmask 1041408   ;;  %v665_v6 = vmov 0   ;;  %vm113_vm1 = vcmask 31744   ;;  %s832_s0 = inlined_call_operand.vmem [shape: f32[4,512], index: 0, kind: input, shape index: {}]   ;;  %s833_s1 = inlined_call_operand.vmem [shape: f32[64,4], index: 1, kind: input, shape index: {}]   ;;  %s834_s2 = inlined_call_operand.vmem [shape: f32[64,1], index: 2, kind: input, shape index: {}]   ;;  %s835_s3 = inlined_call_operand.vmem [shape: f32[32,64], index: 3, kind: input, shape index: {}]   ;;  %s836_s4 = inlined_call_operand.vmem [shape: f32[32,1], index: 4, kind: input, shape index: {}]   ;;  %s837_s5 = inlined_call_operand.vmem [shape: f32[2,32], index: 5, kind: input, shape index: {}]   ;;  %s838_s6 = inlined_call_operand.vmem [shape: f32[2,1], index: 6, kind: input, shape index: {}]   ;;  %s839_s7 = inlined_call_operand.hbm [shape: f32[2,512], index: 7, kind: output, shape index: {}]  }
   0x1   :  { %v61_v0 = vld [vmem:[%s832_s0] sm:$0xff]  ;;  %v62_v1 = vld [vmem:[%s832_s0 + $0x8] sm:$0xff]  ;;  %171 = vmatprep.mubr.bf16.mxu0 %v665_v6  ;;  %244 = vmatprep.mubr.bf16.mxu1 %v665_v6  ;;  %v50_v14 = vld [vmem:[%s834_s2 + $0x10] sm:$0xff] }
   0x2   :  { %v65_v2 = vcombine.high %v61_v0, %v61_v0  ;;  %v66_v3 = vcombine.high %v62_v1, %v62_v1  ;;  %v69_v4 = vpack.c.bf16 %v61_v0, %v61_v0  ;;  %v71_v5 = vpack.c.bf16 %v62_v1, %v62_v1  ;;  %v28_v7 = vld [vmem:[%s833_s1] sm:$0xff]  ;;  %v29_v8 = vld [vmem:[%s833_s1 + $0x8] sm:$0xff]  ;;  %637 = vset.pattern.permute.xlu0 %v665_v6 }
   0x3   :  { %v48_v13 = vld [vmem:[%s834_s2] sm:$0xff]  ;;  %638 = vset.pattern.permute.xlu1 %v665_v6  ;;  %v36_v15 = vpack.c.bf16 %v29_v8, %v28_v7  ;;  %v49_v16 = vld [vmem:[%s834_s2 + $0x8] sm:$0xff] }
   0x4   :  { %v70_v9 = vpack.c.bf16 %v65_v2, %v65_v2  ;;  %v72_v10 = vpack.c.bf16 %v66_v3, %v66_v3  ;;  %v128_v11 = vsel %vm126_vm0, %v69_v4, 0  ;;  %v134_v12 = vsel %vm126_vm0, %v71_v5, 0  ;;  %75 = vperm.xlu0 %637, %v48_v13   ;;  %85 = vperm.xlu1 %638, %v50_v14  }
   0x6   :  { %618 = vmatprep.subr.msk.bf16.mxu0 %vm126_vm0, %v70_v9  ;;  %623 = vmatprep.subr.msk.bf16.mxu1 %vm126_vm0, %v72_v10 }
   0x7   :  { %140 = vmatpush1.bf16.msra.mxu0 %v128_v11  ;;  %213 = vmatpush1.bf16.msra.mxu1 %v134_v12 }
   0x8   :  { %12 = vsyncpa [#allocation3], 0  ;;  %80 = vperm.xlu0 %637, %v49_v16   ;;  %v51_v17 = vld [vmem:[%s834_s2 + $0x18] sm:$0xff]  ;;  %v52_v18 = vld [vmem:[%s834_s2 + $0x20] sm:$0xff]  ;;  %vm353_vm2 = vcmask 523264   ;;  %vm495_vm3 = vcmask 261120  }
   0x9   :  { %v30_v19 = vld [vmem:[%s833_s1 + $0x10] sm:$0xff]  ;;  %v31_v20 = vld [vmem:[%s833_s1 + $0x18] sm:$0xff]  ;;  %90 = vperm.xlu1 %638, %v51_v17   ;;  %v53_v21 = vld [vmem:[%s834_s2 + $0x28] sm:$0xff] }
   0xa   :  { %619 = vmatmul.mubr.msk.bf16.vlgmr.msra.gmra.mrb[0].mxu0 %vm113_vm1, %v36_v15  ;;  %624 = vmatmul.mubr.msk.bf16.vlgmr.msra.gmra.mrb[0].mxu1 %vm113_vm1, %v36_v15  ;;  %v37_v22 = vpack.c.bf16 %v31_v20, %v30_v19  ;;  %v54_v23 = vld [vmem:[%s834_s2 + $0x30] sm:$0xff]  ;;  %v55_v24 = vld [vmem:[%s834_s2 + $0x38] sm:$0xff]  ;;  %v56_v25 = vld [vmem:[%s836_s4] sm:$0xff] }
   0xb   :  { %181 = vmatprep.mubr.bf16.mxu0 %v665_v6  ;;  %254 = vmatprep.mubr.bf16.mxu1 %v665_v6  ;;  %v32_v26 = vld [vmem:[%s833_s1 + $0x20] sm:$0xff]  ;;  %v33_v27 = vld [vmem:[%s833_s1 + $0x28] sm:$0xff]  ;;  %v58_v30 = vld [vmem:[%s836_s4 + $0x10] sm:$0xff] }
   0xc   :  { %95 = vperm.xlu0 %637, %v52_v18   ;;  %v57_v28 = vld [vmem:[%s836_s4 + $0x8] sm:$0xff]  ;;  %v38_v29 = vpack.c.bf16 %v33_v27, %v32_v26  ;;  %v59_v31 = vld [vmem:[%s836_s4 + $0x18] sm:$0xff]  ;;  %v60_v32 = vld [vmem:[%s838_s6] sm:$0x3] }
   0xd   :  { %100 = vperm.xlu1 %638, %v53_v21   ;;  %v34_v33 = vld [vmem:[%s833_s1 + $0x30] sm:$0xff]  ;;  %v35_v34 = vld [vmem:[%s833_s1 + $0x38] sm:$0xff] }
   0xe   :  { %v39_v35 = vpack.c.bf16 %v35_v34, %v34_v33 }
  0x10   :  { %105 = vperm.xlu0 %637, %v54_v23  }
  0x11   :  { %110 = vperm.xlu1 %638, %v55_v24  }
  0x12   :  { %620 = vmatmul.mubr.msk.bf16.gmra.mrb[4].mxu0 %vm113_vm1, %v37_v22  ;;  %625 = vmatmul.mubr.msk.bf16.gmra.mrb[4].mxu1 %vm113_vm1, %v37_v22 }
  0x13   :  { %191 = vmatprep.mubr.bf16.mxu0 %v665_v6  ;;  %264 = vmatprep.mubr.bf16.mxu1 %v665_v6 }
  0x14   :  { %335 = vperm.xlu0 %637, %v56_v25  }
  0x15   :  { %340 = vperm.xlu1 %638, %v57_v28  }
  0x18   :  { %345 = vperm.xlu0 %637, %v58_v30  }
  0x19   :  { %350 = vperm.xlu1 %638, %v59_v31  }
  0x1a   :  { %621 = vmatmul.mubr.msk.bf16.gmra.mrb[8].mxu0 %vm113_vm1, %v38_v29  ;;  %626 = vmatmul.mubr.msk.bf16.gmra.mrb[8].mxu1 %vm113_vm1, %v38_v29 }
  0x1b   :  { %201 = vmatprep.mubr.bf16.mxu0 %v665_v6  ;;  %274 = vmatprep.mubr.bf16.mxu1 %v665_v6 }
  0x1c   :  { %492 = vperm.xlu0 %637, %v60_v32  }
  0x22   :  { %622 = vmatmul.mubr.msk.bf16.gmra.mrb[12].mxu0 %vm113_vm1, %v39_v35  ;;  %627 = vmatmul.mubr.msk.bf16.gmra.mrb[12].mxu1 %vm113_vm1, %v39_v35 }
  0x23   :  { %392 = vmatprep.mubr.bf16.mxu0 %v665_v6  ;;  %445 = vmatprep.mubr.bf16.mxu1 %v665_v6 }
  0x83   :  { %v76_v36 = vpop.permute.xlu0 %75  ;;  %v86_v38 = vpop.permute.xlu1 %85 }
  0x87   :  { %v81_v37 = vpop.permute.xlu0 %80 }
  0x88   :  { %v91_v63 = vpop.permute.xlu1 %90 }
  0x8b   :  { %v96_v29 = vpop.permute.xlu0 %95 }
  0x8c   :  { %v101_v30 = vpop.permute.xlu1 %100 }
  0xdd   :  { %v173_v39 = vpop.f32.mrb[0].mxu0  ;;  %v246_v40 = vpop.f32.mrb[0].mxu1 }
  0xde   :  { %v174_v41 = vadd.f32 %v173_v39, %v76_v36  ;;  %v247_v42 = vadd.f32 %v246_v40, %v76_v36  ;;  %v175_v43 = vpop.f32.mrb[1].mxu0  ;;  %v248_v44 = vpop.f32.mrb[1].mxu1 }
  0xdf   :  { %v176_v45 = vadd.f32 %v175_v43, %v76_v36  ;;  %v249_v46 = vadd.f32 %v248_v44, %v76_v36  ;;  %v177_v47 = vpop.f32.mrb[2].mxu0  ;;  %v250_v48 = vpop.f32.mrb[2].mxu1 }
  0xe0   :  { %v178_v49 = vadd.f32 %v177_v47, %v81_v37  ;;  %v251_v50 = vadd.f32 %v250_v48, %v81_v37  ;;  %v179_v51 = vpop.f32.mrb[3].mxu0  ;;  %v252_v52 = vpop.f32.mrb[3].mxu1  ;;  %v285_v55 = vmax.f32 %v174_v41, 0.0  ;;  %v287_v56 = vmax.f32 %v247_v42, 0.0 }
  0xe1   :  { %v180_v53 = vadd.f32 %v179_v51, %v81_v37  ;;  %v253_v54 = vadd.f32 %v252_v52, %v81_v37  ;;  %v286_v59 = vmax.f32 %v176_v45, 0.0  ;;  %v288_v60 = vmax.f32 %v249_v46, 0.0 }
  0xe2   :  { %v289_v57 = vmax.f32 %v178_v49, 0.0  ;;  %v291_v58 = vmax.f32 %v251_v50, 0.0 }
  0xe3   :  { %v290_v61 = vmax.f32 %v180_v53, 0.0  ;;  %v292_v62 = vmax.f32 %v253_v54, 0.0 }
  0xe4   :  { %v317_v0 = vpack.c.bf16 %v289_v57, %v285_v55  ;;  %v319_v1 = vpack.c.bf16 %v291_v58, %v287_v56 }
  0xe5   :  { %v318_v2 = vpack.c.bf16 %v290_v61, %v286_v59  ;;  %v320_v3 = vpack.c.bf16 %v292_v62, %v288_v60  ;;  %v183_v4 = vpop.f32.mrb[4].mxu0  ;;  %v256_v5 = vpop.f32.mrb[4].mxu1 }
  0xe6   :  { %v184_v7 = vadd.f32 %v183_v4, %v86_v38  ;;  %v257_v8 = vadd.f32 %v256_v5, %v86_v38  ;;  %v185_v9 = vpop.f32.mrb[5].mxu0  ;;  %v258_v10 = vpop.f32.mrb[5].mxu1 }
  0xe7   :  { %v186_v11 = vadd.f32 %v185_v9, %v86_v38  ;;  %v259_v12 = vadd.f32 %v258_v10, %v86_v38  ;;  %v187_v13 = vpop.f32.mrb[6].mxu0  ;;  %v260_v14 = vpop.f32.mrb[6].mxu1  ;;  %360 = vmatprep.subr.bf16.mxu0 %v318_v2  ;;  %413 = vmatprep.subr.bf16.mxu1 %v320_v3 }
  0xe8   :  { %v188_v15 = vadd.f32 %v187_v13, %v91_v63  ;;  %v261_v16 = vadd.f32 %v260_v14, %v91_v63  ;;  %v189_v17 = vpop.f32.mrb[7].mxu0  ;;  %v262_v18 = vpop.f32.mrb[7].mxu1  ;;  %361 = vmatpush1.bf16.msra.mxu0 %v317_v0  ;;  %414 = vmatpush1.bf16.msra.mxu1 %v319_v1  ;;  %v293_v21 = vmax.f32 %v184_v7, 0.0  ;;  %v295_v22 = vmax.f32 %v257_v8, 0.0 }
  0xe9   :  { %v190_v19 = vadd.f32 %v189_v17, %v91_v63  ;;  %v263_v20 = vadd.f32 %v262_v18, %v91_v63  ;;  %v294_v25 = vmax.f32 %v186_v11, 0.0  ;;  %v296_v26 = vmax.f32 %v259_v12, 0.0  ;;  %v106_v59 = vpop.permute.xlu0 %105  ;;  %v111_v60 = vpop.permute.xlu1 %110 }
  0xea   :  { %v297_v23 = vmax.f32 %v188_v15, 0.0  ;;  %v299_v24 = vmax.f32 %v261_v16, 0.0 }
  0xeb   :  { %v298_v27 = vmax.f32 %v190_v19, 0.0  ;;  %v300_v28 = vmax.f32 %v263_v20, 0.0 }
  0xec   :  { %v321_v31 = vpack.c.bf16 %v297_v23, %v293_v21  ;;  %v323_v32 = vpack.c.bf16 %v299_v24, %v295_v22 }
  0xed   :  { %v322_v33 = vpack.c.bf16 %v298_v27, %v294_v25  ;;  %v324_v34 = vpack.c.bf16 %v300_v28, %v296_v26  ;;  %v193_v35 = vpop.f32.mrb[8].mxu0  ;;  %v266_v36 = vpop.f32.mrb[8].mxu1  ;;  %v40_v28 = vld [vmem:[%s835_s3] sm:$0xff] }
  0xee   :  { %v194_v37 = vadd.f32 %v193_v35, %v96_v29  ;;  %v267_v38 = vadd.f32 %v266_v36, %v96_v29  ;;  %v195_v39 = vpop.f32.mrb[9].mxu0  ;;  %v268_v40 = vpop.f32.mrb[9].mxu1 }
  0xef   :  { %v196_v41 = vadd.f32 %v195_v39, %v96_v29  ;;  %v269_v42 = vadd.f32 %v268_v40, %v96_v29  ;;  %v197_v43 = vpop.f32.mrb[10].mxu0  ;;  %v270_v44 = vpop.f32.mrb[10].mxu1  ;;  %362 = vmatprep.subr.bf16.mxu0 %v322_v33  ;;  %415 = vmatprep.subr.bf16.mxu1 %v324_v34  ;;  %v41_v29 = vld [vmem:[%s835_s3 + $0x8] sm:$0xff]  ;;  %v42_v33 = vld [vmem:[%s835_s3 + $0x10] sm:$0xff]  ;;  %v43_v34 = vld [vmem:[%s835_s3 + $0x18] sm:$0xff] }
  0xf0   :  { %v198_v45 = vadd.f32 %v197_v43, %v101_v30  ;;  %v271_v46 = vadd.f32 %v270_v44, %v101_v30  ;;  %v199_v47 = vpop.f32.mrb[11].mxu0  ;;  %v272_v48 = vpop.f32.mrb[11].mxu1  ;;  %363 = vmatpush1.bf16.msra.mxu0 %v321_v31  ;;  %416 = vmatpush1.bf16.msra.mxu1 %v323_v32  ;;  %v301_v51 = vmax.f32 %v194_v37, 0.0  ;;  %v303_v52 = vmax.f32 %v267_v38, 0.0 }
  0xf1   :  { %v200_v49 = vadd.f32 %v199_v47, %v101_v30  ;;  %v273_v50 = vadd.f32 %v272_v48, %v101_v30  ;;  %v302_v55 = vmax.f32 %v196_v41, 0.0  ;;  %v304_v56 = vmax.f32 %v269_v42, 0.0  ;;  %v336_v36 = vpop.permute.xlu0 %335  ;;  %v341_v37 = vpop.permute.xlu1 %340 }
  0xf2   :  { %v305_v53 = vmax.f32 %v198_v45, 0.0  ;;  %v307_v54 = vmax.f32 %v271_v46, 0.0  ;;  %v44_v32 = vpack.c.bf16 %v41_v29, %v40_v28  ;;  %v45_v35 = vpack.c.bf16 %v43_v34, %v42_v33 }
  0xf3   :  { %v306_v57 = vmax.f32 %v200_v49, 0.0  ;;  %v308_v58 = vmax.f32 %v273_v50, 0.0  ;;  %v666_v34 = vmov 1983009808  }
  0xf4   :  { %v325_v61 = vpack.c.bf16 %v305_v53, %v301_v51  ;;  %v327_v62 = vpack.c.bf16 %v307_v54, %v303_v52 }
  0xf5   :  { %v326_v63 = vpack.c.bf16 %v306_v57, %v302_v55  ;;  %v328_v0 = vpack.c.bf16 %v308_v58, %v304_v56  ;;  %v203_v1 = vpop.f32.mrb[12].mxu0  ;;  %v276_v2 = vpop.f32.mrb[12].mxu1 }
  0xf6   :  { %v204_v3 = vadd.f32 %v203_v1, %v106_v59  ;;  %v277_v4 = vadd.f32 %v276_v2, %v106_v59  ;;  %v205_v5 = vpop.f32.mrb[13].mxu0  ;;  %v278_v7 = vpop.f32.mrb[13].mxu1 }
  0xf7   :  { %v206_v8 = vadd.f32 %v205_v5, %v106_v59  ;;  %v279_v9 = vadd.f32 %v278_v7, %v106_v59  ;;  %v207_v10 = vpop.f32.mrb[14].mxu0  ;;  %v280_v11 = vpop.f32.mrb[14].mxu1  ;;  %364 = vmatprep.subr.bf16.mxu0 %v326_v63  ;;  %417 = vmatprep.subr.bf16.mxu1 %v328_v0 }
  0xf8   :  { %v208_v12 = vadd.f32 %v207_v10, %v111_v60  ;;  %v281_v13 = vadd.f32 %v280_v11, %v111_v60  ;;  %v209_v14 = vpop.f32.mrb[15].mxu0  ;;  %v282_v15 = vpop.f32.mrb[15].mxu1  ;;  %365 = vmatpush1.bf16.msra.mxu0 %v325_v61  ;;  %418 = vmatpush1.bf16.msra.mxu1 %v327_v62  ;;  %v309_v18 = vmax.f32 %v204_v3, 0.0  ;;  %v311_v19 = vmax.f32 %v277_v4, 0.0 }
  0xf9   :  { %v210_v16 = vadd.f32 %v209_v14, %v111_v60  ;;  %v283_v17 = vadd.f32 %v282_v15, %v111_v60  ;;  %v310_v22 = vmax.f32 %v206_v8, 0.0  ;;  %v312_v23 = vmax.f32 %v279_v9, 0.0  ;;  %v346_v61 = vpop.permute.xlu0 %345  ;;  %v351_v62 = vpop.permute.xlu1 %350 }
  0xfa   :  { %v313_v20 = vmax.f32 %v208_v12, 0.0  ;;  %v315_v21 = vmax.f32 %v281_v13, 0.0 }
  0xfb   :  { %v314_v24 = vmax.f32 %v210_v16, 0.0  ;;  %v316_v25 = vmax.f32 %v283_v17, 0.0 }
  0xfc   :  { %v329_v26 = vpack.c.bf16 %v313_v20, %v309_v18  ;;  %v331_v27 = vpack.c.bf16 %v315_v21, %v311_v19 }
  0xfd   :  { %v330_v30 = vpack.c.bf16 %v314_v24, %v310_v22  ;;  %v332_v31 = vpack.c.bf16 %v316_v25, %v312_v23 }
  0xff   :  { %366 = vmatprep.subr.bf16.mxu0 %v330_v30  ;;  %419 = vmatprep.subr.bf16.mxu1 %v332_v31  ;;  %v46_v30 = vld [vmem:[%s837_s5] sm:$0x3]  ;;  %s667_s5 = smov [#allocation2]  }
 0x100   :  { %367 = vmatpush1.bf16.msra.mxu0 %v329_v26  ;;  %420 = vmatpush1.bf16.msra.mxu1 %v331_v27  ;;  %v47_v33 = vpack.c.bf16 %v46_v30, %v46_v30  ;;  %s610_s27 = sshll.u32 %s667_s5, 4  ;;  %s611_s27 = int_to_ptr.vmem [resolvable:$true] %s610_s27 }
 0x101   :  { %s641_s28 = scalar_lea.vmem %s611_s27, 128  ;;  %p646_p1 = scmp.lt.s32.totalorder %s611_s27, %s611_s27 }
 0x102   :  { %p642_p0 = scmp.ne.s32.totalorder %s611_s27, %s641_s28  ;;  %p647_p2 = scmp.lt.s32.totalorder %s641_s28, %s641_s28 }
 0x103   :  { %628 = vmatmul.mubr.msk.bf16.vlgmr.msra.gmra.mrb[16].mxu0 %vm353_vm2, %v44_v32  ;;  %630 = vmatmul.mubr.msk.bf16.vlgmr.msra.gmra.mrb[16].mxu1 %vm353_vm2, %v44_v32 }
 0x104   :  { %402 = vmatprep.mubr.bf16.mxu0 %v665_v6  ;;  %455 = vmatprep.mubr.bf16.mxu1 %v665_v6  ;;  %p648_p3 = por %p647_p2, %p646_p1 }
 0x106   :  { %p649_p4 = pnand %p648_p3, %p642_p0 }
 0x10b   :  { %629 = vmatmul.mubr.msk.bf16.gmra.mrb[20].mxu0 %vm353_vm2, %v45_v35  ;;  %631 = vmatmul.mubr.msk.bf16.gmra.mrb[20].mxu1 %vm353_vm2, %v45_v35  ;;  %v588_v35 = vunpack.c.l.s4 %v666_v34 }
 0x10c   :  { %531 = vmatprep.mubr.bf16.mxu0 %v665_v6  ;;  %572 = vmatprep.mubr.bf16.mxu1 %v665_v6 }
 0x1d6   :  { %v394_v38 = vpop.f32.mrb[16].mxu0  ;;  %v447_v39 = vpop.f32.mrb[16].mxu1 }
 0x1d7   :  { %v395_v40 = vadd.f32 %v394_v38, %v336_v36  ;;  %v448_v41 = vadd.f32 %v447_v39, %v336_v36  ;;  %v396_v42 = vpop.f32.mrb[17].mxu0  ;;  %v449_v43 = vpop.f32.mrb[17].mxu1 }
 0x1d8   :  { %v397_v44 = vadd.f32 %v396_v42, %v336_v36  ;;  %v450_v45 = vadd.f32 %v449_v43, %v336_v36  ;;  %v398_v46 = vpop.f32.mrb[18].mxu0  ;;  %v451_v47 = vpop.f32.mrb[18].mxu1  ;;  %v590_v36 = vlaneseq }
 0x1d9   :  { %v399_v48 = vadd.f32 %v398_v46, %v341_v37  ;;  %v452_v49 = vadd.f32 %v451_v47, %v341_v37  ;;  %v400_v50 = vpop.f32.mrb[19].mxu0  ;;  %v453_v51 = vpop.f32.mrb[19].mxu1  ;;  %v466_v54 = vmax.f32 %v395_v40, 0.0  ;;  %v468_v6 = vmax.f32 %v448_v41, 0.0 }
 0x1da   :  { %v401_v52 = vadd.f32 %v400_v50, %v341_v37  ;;  %v454_v53 = vadd.f32 %v453_v51, %v341_v37  ;;  %v467_v57 = vmax.f32 %v397_v44, 0.0  ;;  %v469_v58 = vmax.f32 %v450_v45, 0.0  ;;  %v493_v39 = vpop.permute.xlu0 %492 }
 0x1db   :  { %v470_v55 = vmax.f32 %v399_v48, 0.0  ;;  %v472_v56 = vmax.f32 %v452_v49, 0.0  ;;  %v589_v37 = vunpack.c.0.s8 %v588_v35  ;;  %v591_v38 = vshrl.u32 %v590_v36, 7 }
 0x1dc   :  { %v471_v59 = vmax.f32 %v401_v52, 0.0  ;;  %v473_v60 = vmax.f32 %v454_v53, 0.0 }
 0x1dd   :  { %v482_v63 = vpack.c.bf16 %v470_v55, %v466_v54  ;;  %v484_v0 = vpack.c.bf16 %v472_v56, %v468_v6  ;;  %v592_v50 = vsub.s32 %v589_v37, %v591_v38 }
 0x1de   :  { %v483_v1 = vpack.c.bf16 %v471_v59, %v467_v57  ;;  %v485_v2 = vpack.c.bf16 %v473_v60, %v469_v58  ;;  %v404_v3 = vpop.f32.mrb[20].mxu0  ;;  %v457_v4 = vpop.f32.mrb[20].mxu1 }
 0x1df   :  { %v405_v5 = vadd.f32 %v404_v3, %v346_v61  ;;  %v458_v7 = vadd.f32 %v457_v4, %v346_v61  ;;  %v406_v8 = vpop.f32.mrb[21].mxu0  ;;  %v459_v9 = vpop.f32.mrb[21].mxu1 }
 0x1e0   :  { %v407_v10 = vadd.f32 %v406_v8, %v346_v61  ;;  %v460_v11 = vadd.f32 %v459_v9, %v346_v61  ;;  %v408_v12 = vpop.f32.mrb[22].mxu0  ;;  %v461_v13 = vpop.f32.mrb[22].mxu1  ;;  %499 = vmatprep.subr.bf16.mxu0 %v483_v1  ;;  %540 = vmatprep.subr.bf16.mxu1 %v485_v2 }
 0x1e1   :  { %v409_v14 = vadd.f32 %v408_v12, %v351_v62  ;;  %v462_v15 = vadd.f32 %v461_v13, %v351_v62  ;;  %v410_v16 = vpop.f32.mrb[23].mxu0  ;;  %v463_v17 = vpop.f32.mrb[23].mxu1  ;;  %500 = vmatpush1.bf16.msra.mxu0 %v482_v63  ;;  %541 = vmatpush1.bf16.msra.mxu1 %v484_v0  ;;  %v474_v20 = vmax.f32 %v405_v5, 0.0  ;;  %v476_v21 = vmax.f32 %v458_v7, 0.0 }
 0x1e2   :  { %v411_v18 = vadd.f32 %v410_v16, %v351_v62  ;;  %v464_v19 = vadd.f32 %v463_v17, %v351_v62  ;;  %v475_v24 = vmax.f32 %v407_v10, 0.0  ;;  %v477_v25 = vmax.f32 %v460_v11, 0.0 }
 0x1e3   :  { %v478_v22 = vmax.f32 %v409_v14, 0.0  ;;  %v480_v23 = vmax.f32 %v462_v15, 0.0 }
 0x1e4   :  { %v479_v26 = vmax.f32 %v411_v18, 0.0  ;;  %v481_v27 = vmax.f32 %v464_v19, 0.0 }
 0x1e5   :  { %v486_v28 = vpack.c.bf16 %v478_v22, %v474_v20  ;;  %v488_v29 = vpack.c.bf16 %v480_v23, %v476_v21 }
 0x1e6   :  { %v487_v31 = vpack.c.bf16 %v479_v26, %v475_v24  ;;  %v489_v32 = vpack.c.bf16 %v481_v27, %v477_v25 }
 0x1e8   :  { %501 = vmatprep.subr.bf16.mxu0 %v487_v31  ;;  %542 = vmatprep.subr.bf16.mxu1 %v489_v32 }
 0x1e9   :  { %502 = vmatpush1.bf16.msra.mxu0 %v486_v28  ;;  %543 = vmatpush1.bf16.msra.mxu1 %v488_v29 }
 0x1ec   :  { %632 = vmatmul.mubr.msk.bf16.vlgmr.msra.gmra.mrb[24].mxu0 %vm495_vm3, %v47_v33  ;;  %633 = vmatmul.mubr.msk.bf16.vlgmr.msra.gmra.mrb[24].mxu1 %vm495_vm3, %v47_v33 }
 0x2bf   :  { %v533_v40 = vpop.f32.mrb[24].mxu0  ;;  %v574_v41 = vpop.f32.mrb[24].mxu1 }
 0x2c0   :  { %v534_v42 = vadd.f32 %v533_v40, %v493_v39  ;;  %v575_v43 = vadd.f32 %v574_v41, %v493_v39  ;;  %v535_v44 = vpop.f32.mrb[25].mxu0  ;;  %v576_v45 = vpop.f32.mrb[25].mxu1 }
 0x2c1   :  { %v536_v46 = vadd.f32 %v535_v44, %v493_v39  ;;  %v577_v47 = vadd.f32 %v576_v45, %v493_v39  ;;  %v537_v48 = vpop.f32.mrb[26].mxu0  ;;  %v578_v49 = vpop.f32.mrb[26].mxu1 }
 0x2c2   :  { %v538_v51 = vpop.f32.mrb[27].mxu0  ;;  %v579_v52 = vpop.f32.mrb[27].mxu1 }
 0x2c3   :  { %v585_v53 = vcombine.low %v534_v42, %v536_v46  ;;  %v586_v54 = vcombine.low %v575_v43, %v577_v47 }
 0x2c5   :  { %v593_v6 = vrot.slane %v585_v53, %v592_v50  ;;  %v600_v55 = vrot.slane %v586_v54, %v592_v50 }
 0x2c7   :  { %v601_v56 = vcombine.low %v593_v6, %v600_v55 }
 0x2c9   :  { %603 = vst [vmem:[#allocation2] sm:$0xff] %v601_v56 }
 0x2ca   :  { %652 = shalt.err (!%p649_p4)
}
 0x2cb   :  { %s653_s8 = scalar_lea.hbm %s839_s7, 128 }
 0x2cc   :  { %p654_p5 = scmp.ne.s32.totalorder %s839_s7, %s653_s8  ;;  %p657_p6 = scmp.lt.u32.totalorder %s653_s8, %s839_s7 }
 0x2ce   :  { %p659_p7 = pnand %p657_p6, %p654_p5 }
 0x2d0   :  { %662 = shalt.err (!%p659_p7)
}
 0x2d1   :  { %613 = dma.vmem_to_hbm [thread:$0]  %s611_s27, 128, %s839_s7, [#allocation3]  }
 0x2d2   :  { %663 = dma.done.wait [#allocation3], 128  }
 0x2d3   :  { %664 = vsyncadd [#allocation3], 4294967168 }
 0x2d4   :  { %617 = vsyncpa [#allocation3], 1 }

</bundles_post_ra>
